<compile_context>
chip_gen: v7x
topology: tpu7x:2x2x1
jax: 0.10.0
libtpu: 0.0.40
codegen_flags: <defaults>
</compile_context>

<pallas_src>
import functools

import jax
import jax.numpy as jnp
from jax.experimental import pallas as pl
from jax.experimental.pallas import tpu as pltpu

FRAME_NUM = 8          # frame_num (pool window over frames)
FEAT = 128             # dense_feature_num
NUM_CLASSES = 7        # num_classes
NUM_MIX = 3            # num_mixtures

GATE_W = NUM_CLASSES * (NUM_MIX + 1)   # 28 gate columns (mixture-major)
EXPERT_W = NUM_CLASSES * NUM_MIX       # 21 expert columns (mixture-major)
PAD_W = 128                            # lane-dense fused / output width
EXPERT_OFF = PAD_W // 2                # expert lanes start half a vreg away (64)
assert GATE_W <= EXPERT_OFF and EXPERT_OFF + EXPERT_W <= PAD_W

X_TILE_BYTES = 8 * 1024 * 1024         # per-buffer budget for the bf16 x tile
MAX_TILE_B = 4096
VMEM_LIMIT_BYTES = 48 * 1024 * 1024    # <= v7x's 64 MiB; plenty on v5e/v6e


def _round_up(n, m):
    return ((n + m - 1) // m) * m


def moe_kernel(x_ref, w_ref, b_ref, rn_ref, rd_ref, out_ref):
    # x_ref: (TB, F*D) bf16; w_ref: (F*D, 128) bf16; b_ref: (1, 128) f32
    # rn_ref/rd_ref: (128, 128) f32 constant mixture-sum matrices
    # out_ref: (TB, 128) f32 (classes in lanes 0..6)
    C = NUM_CLASSES
    lane = jax.lax.broadcasted_iota(jnp.int32, (1, PAD_W), 1)       # (1, 128)

    # Single fused bf16 matmul (frame mean already folded into the weights).
    logits = jnp.dot(x_ref[...], w_ref[...],
                     preferred_element_type=jnp.float32) + b_ref[...]   # (TB, 128) f32

    # Softmax stabilization: subtract the per-row max over the 28 gate lanes.
    # Any per-row constant cancels within each per-class softmax, so a plain
    # full-lane reduction works (no stride-7 cross-lane gathers).
    gate_mask = lane < GATE_W
    g_max = jnp.max(jnp.where(gate_mask, logits, -jnp.inf),
                    axis=1, keepdims=True)                              # (TB, 1)
    shifted = logits - jnp.where(gate_mask, g_max, 0.0)

    # One full-width exp:
    #   gate lanes  m*7+c      -> exp(g_{m,c} - g_max)   in (0, 1]
    #   expert lanes 64+m*7+c  -> exp(-e_{m,c})          (weights were negated)
    #   pad lanes              -> exp(0) = 1
    # Clamp so a huge exp(-e) can never feed inf into the 0-weight lanes of the
    # reduction matmuls (inf * 0 would poison the accumulation with NaN).
    e = jnp.minimum(jnp.exp(shifted), jnp.float32(3.0e38))             # (TB, 128)

    # Bring the expert lanes on top of the gate lanes.  The shift equals half
    # the lane width, so the permutation is identical for either roll direction.
    e_exp = pltpu.roll(e, shift=EXPERT_OFF, axis=1)                    # lanes m*7+c = exp(-e)
    sig = pl.reciprocal(1.0 + e_exp, approx=False)                     # sigmoid(e) at lanes 0..20
    prod = e * sig                                                     # exp(g-gmax)*sigmoid(e)

    # Per-class sums over mixtures via constant 0/1 matmuls (idle MXU):
    #   num_c = sum_{m<3} prod[:, m*7+c]     den_c = sum_{m<4} e[:, m*7+c]
    num = jnp.dot(prod, rn_ref[...], preferred_element_type=jnp.float32)
    den = jnp.dot(e, rd_ref[...], preferred_element_type=jnp.float32)

    # Single unmasked full-width store (classes in lanes 0..6, zeros elsewhere).
    out = jnp.where(lane < C, num * pl.reciprocal(den, approx=False), 0.0)
    out_ref[...] = out.astype(out_ref.dtype)


def _fuse_params(Wg, bg, We, be, frame_num):
    """Pack PyTorch-layout Linear params into one (F*D, 128) bf16 weight slab
    (frame-mean and expert negation folded in) plus one (1, 128) f32 bias row.

    PyTorch: gated output column c*(M+1)+m <-> (class c, mixture m)
             expert output column c*M+m    <-> (class c, mixture m)
    Fused:   gate  (m, c) -> lane m*C + c
             expert(m, c) -> lane EXPERT_OFF + m*C + c   (negated, for sigmoid
                             via 1/(1+exp(-e)) off the shared full-width exp)
    """
    C, M = NUM_CLASSES, NUM_MIX
    D = Wg.shape[1]
    wg = Wg.reshape(C, M + 1, D).transpose(1, 0, 2).reshape(GATE_W, D)
    we = We.reshape(C, M, D).transpose(1, 0, 2).reshape(EXPERT_W, D)

    w = jnp.zeros((PAD_W, D), jnp.float32)
    w = w.at[:GATE_W].set(wg)
    w = w.at[EXPERT_OFF:EXPERT_OFF + EXPERT_W].set(-we)
    w = w.T                                                   # (D, 128)
    # Fold AvgPool2d((F,1)) into the matmul: replicate over frames, scale 1/F.
    w = jnp.tile(w, (frame_num, 1)) * (1.0 / frame_num)        # (F*D, 128)

    b = jnp.zeros((1, PAD_W), jnp.float32)
    b = b.at[0, :GATE_W].set(bg.reshape(C, M + 1).T.reshape(-1))
    b = b.at[0, EXPERT_OFF:EXPERT_OFF + EXPERT_W].set(-be.reshape(C, M).T.reshape(-1))
    return w.astype(jnp.bfloat16), b


def _reduction_mats():
    """Constant 0/1 matrices summing mixture groups into class lanes 0..6."""
    rows = jnp.arange(PAD_W)[:, None]
    cols = jnp.arange(PAD_W)[None, :]
    hit = (rows % NUM_CLASSES) == cols                 # only true for cols < C
    rn = (hit & (rows < NUM_MIX * NUM_CLASSES)).astype(jnp.float32)        # m = 0..2
    rd = (hit & (rows < (NUM_MIX + 1) * NUM_CLASSES)).astype(jnp.float32)  # m = 0..3
    return rn, rd


@functools.partial(jax.jit, static_argnames=("tile_b", "core_parallel"))
def video_net_moe(x, Wg, bg, We, be, *, tile_b=None, core_parallel=False):
    """x: (B, F, D) or (B, 1, F, D), f32 or bf16.  Returns (B, NUM_CLASSES) f32."""
    if x.ndim == 4:                       # NCHW with C == 1, as in the PyTorch module
        x = x[:, 0]
    B, F, D = x.shape
    K = F * D

    w_all, b_all = _fuse_params(Wg, bg, We, be, F)
    rn, rd = _reduction_mats()

    # Stream x as bf16 with frames folded into the contraction (K) dimension.
    x2 = x.astype(jnp.bfloat16).reshape(B, K)

    # Batch tile: ~8 MiB bf16 x buffer per pipeline slot (=> tb=4096 at K=1024),
    # capped at 4096.  Fits v7x's 64 MiB VMEM under the 48 MiB limit and
    # amortizes the ~0.35us/step overhead on v5e/v6e's 128 MiB VMEM.
    if tile_b is None:
        tile_b = max(8, min(MAX_TILE_B, (X_TILE_BYTES // (K * 2)) // 8 * 8))
    tb = _round_up(min(tile_b, _round_up(B, 8)), 8)
    Bp = _round_up(B, tb)
    if Bp != B:
        x2 = jnp.pad(x2, ((0, Bp - B), (0, 0)))
    grid = (Bp // tb,)

    # On v7x (2 TensorCores/chip) pass core_parallel=True to explicitly shard
    # the batch axis across cores; plain PARALLEL is the safe default elsewhere.
    batch_sem = pltpu.CORE_PARALLEL if core_parallel else pltpu.PARALLEL

    out = pl.pallas_call(
        moe_kernel,
        out_shape=jax.ShapeDtypeStruct((Bp, PAD_W), jnp.float32),
        grid_spec=pltpu.PrefetchScalarGridSpec(
            num_scalar_prefetch=0,
            grid=grid,
            in_specs=[
                pl.BlockSpec((tb, K), lambda i: (i, 0)),          # streamed bf16 x tiles
                pl.BlockSpec((K, PAD_W), lambda i: (0, 0)),       # resident fused weights
                pl.BlockSpec((1, PAD_W), lambda i: (0, 0)),       # resident bias
                pl.BlockSpec((PAD_W, PAD_W), lambda i: (0, 0)),   # resident reduction mats
                pl.BlockSpec((PAD_W, PAD_W), lambda i: (0, 0)),
            ],
            out_specs=pl.BlockSpec((tb, PAD_W), lambda i: (i, 0)),  # lane-dense output
        ),
        compiler_params=pltpu.CompilerParams(
            dimension_semantics=(batch_sem,),
            vmem_limit_bytes=VMEM_LIMIT_BYTES,
        ),
    )(x2, w_all, b_all, rn, rd)

    return out[:B, :NUM_CLASSES]


def reference(x, Wg, bg, We, be):
    """Pure-JAX mirror of the PyTorch forward (correctness check)."""
    if x.ndim == 4:
        x = x[:, 0]
    pooled = x.astype(jnp.float32).mean(axis=1)                     # (B, D)
    gated = pooled @ Wg.T + bg                                      # (B, C*(M+1))
    gated = jax.nn.softmax(gated.reshape(-1, NUM_MIX + 1), axis=1)
    expert = jax.nn.sigmoid((pooled @ We.T + be).reshape(-1, NUM_MIX))
    out = jnp.sum(expert * gated[:, :NUM_MIX], axis=1)
    return out.reshape(-1, NUM_CLASSES)


if __name__ == "__main__":
    key = jax.random.PRNGKey(0)
    k1, k2, k3, k4, k5 = jax.random.split(key, 5)

    bound = 1.0 / (FEAT ** 0.5)
    # PyTorch-layout parameters: Linear weight is (out_features, in_features).
    Wg = jax.random.uniform(k1, (GATE_W, FEAT), minval=-bound, maxval=bound,
                            dtype=jnp.float32)
    bg = jax.random.uniform(k2, (GATE_W,), minval=-bound, maxval=bound,
                            dtype=jnp.float32)
    We = jax.random.uniform(k3, (EXPERT_W, FEAT), minval=-bound, maxval=bound,
                            dtype=jnp.float32)
    be = jax.random.uniform(k4, (EXPERT_W,), minval=-bound, maxval=bound,
                            dtype=jnp.float32)

    # Example input: batch=2, frames=8, features=128 (3-D path in the module).
    x = jax.random.normal(k5, (2, FRAME_NUM, FEAT), dtype=jnp.float32)

    out = jax.block_until_ready(video_net_moe(x, Wg, bg, We, be))
    assert out.shape == (2, NUM_CLASSES)

    # The kernel streams x (and holds the fused weights) in bf16, so compare
    # against a reference fed the same bf16-rounded input; remaining error
    # (bf16 weight rounding, folded-mean accumulation order) is ~1e-3.
    x_q = x.astype(jnp.bfloat16).astype(jnp.float32)
    ref = reference(x_q, Wg, bg, We, be)
    assert jnp.allclose(out, ref, rtol=5e-3, atol=5e-3), (out, ref)

    print("KERNEL_OK")
</pallas_src>

<mosaic_0001>
module attributes {stable_mosaic.version = 11 : i64} {
  func.func @moe_kernel(%arg0: i32, %arg1: memref<8x1024xbf16, #tpu.memory_space<vmem>>, %arg2: memref<1024x128xbf16, #tpu.memory_space<vmem>>, %arg3: memref<1x128xf32, #tpu.memory_space<vmem>>, %arg4: memref<128x128xf32, #tpu.memory_space<vmem>>, %arg5: memref<128x128xf32, #tpu.memory_space<vmem>>, %arg6: memref<8x128xf32, #tpu.memory_space<vmem>>) attributes {dimension_semantics = [#tpu.dimension_semantics<parallel>], iteration_bounds = array<i64: 1>, scalar_prefetch = 0 : i64, scratch_operands = 0 : i64, tpu.core_type = #tpu.core_type<tc>, window_params = [{transform_indices = @transform_0, window_bounds = array<i64: 8, 1024>}, {pipeline_mode = #tpu.pipeline_mode<synchronous>, transform_indices = @transform_1, window_bounds = array<i64: 1024, 128>}, {pipeline_mode = #tpu.pipeline_mode<synchronous>, transform_indices = @transform_2, window_bounds = array<i64: 1, 128>}, {pipeline_mode = #tpu.pipeline_mode<synchronous>, transform_indices = @transform_3, window_bounds = array<i64: 128, 128>}, {pipeline_mode = #tpu.pipeline_mode<synchronous>, transform_indices = @transform_4, window_bounds = array<i64: 128, 128>}, {transform_indices = @transform_5, window_bounds = array<i64: 8, 128>}]} {
    %0 = tpu.iota {dimensions = array<i32: 1>} : vector<1x128xi32>
    %c0 = arith.constant 0 : index
    %c0_0 = arith.constant 0 : index
    %1 = vector.load %arg1[%c0, %c0_0] : memref<8x1024xbf16, #tpu.memory_space<vmem>>, vector<8x1024xbf16>
    %c0_1 = arith.constant 0 : index
    %c0_2 = arith.constant 0 : index
    %2 = vector.load %arg2[%c0_1, %c0_2] : memref<1024x128xbf16, #tpu.memory_space<vmem>>, vector<1024x128xbf16>
    %cst = arith.constant dense<0.000000e+00> : vector<8x128xf32>
    %3 = tpu.matmul %1, %2, %cst {dimension_numbers = #tpu.dot_dimension_numbers<[1], [0], [0], [1], [0, 0, 1, 1], [], []>} : vector<8x1024xbf16>, vector<1024x128xbf16>, vector<8x128xf32> -> vector<8x128xf32>
    %c0_3 = arith.constant 0 : index
    %c0_4 = arith.constant 0 : index
    %4 = vector.load %arg3[%c0_3, %c0_4] : memref<1x128xf32, #tpu.memory_space<vmem>>, vector<1x128xf32>
    %5 = vector.broadcast %4 : vector<1x128xf32> to vector<8x128xf32>
    %6 = arith.addf %3, %5 : vector<8x128xf32>
    %c28_i32 = arith.constant 28 : i32
    %7 = vector.broadcast %c28_i32 : i32 to vector<1x128xi32>
    %8 = arith.cmpi slt, %0, %7 : vector<1x128xi32>
    %cst_5 = arith.constant 0xFF800000 : f32
    %9 = vector.shape_cast %8 : vector<1x128xi1> to vector<1x128xi1>
    %10 = vector.broadcast %9 : vector<1x128xi1> to vector<8x128xi1>
    %11 = vector.broadcast %cst_5 : f32 to vector<8x128xf32>
    %12 = arith.select %10, %6, %11 : vector<8x128xi1>, vector<8x128xf32>
    %cst_6 = arith.constant dense<0xFF800000> : vector<8xf32>
    %13 = vector.multi_reduction <maximumf>, %12, %cst_6 [1] : vector<8x128xf32> to vector<8xf32>
    %14 = vector.shape_cast %13 : vector<8xf32> to vector<8x1xf32>
    %cst_7 = arith.constant 0.000000e+00 : f32
    %15 = vector.shape_cast %8 : vector<1x128xi1> to vector<1x128xi1>
    %16 = vector.broadcast %15 : vector<1x128xi1> to vector<8x128xi1>
    %17 = vector.shape_cast %14 : vector<8x1xf32> to vector<8x1xf32>
    %18 = vector.broadcast %17 : vector<8x1xf32> to vector<8x128xf32>
    %19 = vector.broadcast %cst_7 : f32 to vector<8x128xf32>
    %20 = arith.select %16, %18, %19 : vector<8x128xi1>, vector<8x128xf32>
    %21 = arith.subf %6, %20 : vector<8x128xf32>
    %22 = math.exp %21 : vector<8x128xf32>
    %cst_8 = arith.constant 3.000000e+38 : f32
    %23 = vector.broadcast %cst_8 : f32 to vector<8x128xf32>
    %24 = arith.minimumf %22, %23 : vector<8x128xf32>
    %c64_i32 = arith.constant 64 : i32
    %25 = tpu.dynamic_rotate %24 by %c64_i32 dim 1 : vector<8x128xf32>, i32 -> vector<8x128xf32>
    %cst_9 = arith.constant 1.000000e+00 : f32
    %26 = vector.broadcast %cst_9 : f32 to vector<8x128xf32>
    %27 = arith.addf %26, %25 : vector<8x128xf32>
    %28 = tpu.reciprocal %27 : vector<8x128xf32> -> vector<8x128xf32>
    %29 = arith.mulf %24, %28 : vector<8x128xf32>
    %c0_10 = arith.constant 0 : index
    %c0_11 = arith.constant 0 : index
    %30 = vector.load %arg4[%c0_10, %c0_11] : memref<128x128xf32, #tpu.memory_space<vmem>>, vector<128x128xf32>
    %cst_12 = arith.constant dense<0.000000e+00> : vector<8x128xf32>
    %31 = tpu.matmul %29, %30, %cst_12 {dimension_numbers = #tpu.dot_dimension_numbers<[1], [0], [0], [1], [0, 0, 1, 1], [], []>} : vector<8x128xf32>, vector<128x128xf32>, vector<8x128xf32> -> vector<8x128xf32>
    %c0_13 = arith.constant 0 : index
    %c0_14 = arith.constant 0 : index
    %32 = vector.load %arg5[%c0_13, %c0_14] : memref<128x128xf32, #tpu.memory_space<vmem>>, vector<128x128xf32>
    %cst_15 = arith.constant dense<0.000000e+00> : vector<8x128xf32>
    %33 = tpu.matmul %24, %32, %cst_15 {dimension_numbers = #tpu.dot_dimension_numbers<[1], [0], [0], [1], [0, 0, 1, 1], [], []>} : vector<8x128xf32>, vector<128x128xf32>, vector<8x128xf32> -> vector<8x128xf32>
    %c7_i32 = arith.constant 7 : i32
    %34 = vector.broadcast %c7_i32 : i32 to vector<1x128xi32>
    %35 = arith.cmpi slt, %0, %34 : vector<1x128xi32>
    %36 = tpu.reciprocal %33 : vector<8x128xf32> -> vector<8x128xf32>
    %37 = arith.mulf %31, %36 : vector<8x128xf32>
    %cst_16 = arith.constant 0.000000e+00 : f32
    %38 = vector.shape_cast %35 : vector<1x128xi1> to vector<1x128xi1>
    %39 = vector.broadcast %38 : vector<1x128xi1> to vector<8x128xi1>
    %40 = vector.broadcast %cst_16 : f32 to vector<8x128xf32>
    %41 = arith.select %39, %37, %40 : vector<8x128xi1>, vector<8x128xf32>
    %c0_17 = arith.constant 0 : index
    %c0_18 = arith.constant 0 : index
    %42 = vector.load %arg6[%c0_17, %c0_18] : memref<8x128xf32, #tpu.memory_space<vmem>>, vector<8x128xf32>
    tpu.vector_store %arg6[%c0_17, %c0_18], %41 {strides = array<i32>} : memref<8x128xf32, #tpu.memory_space<vmem>>, vector<8x128xf32>,
    return
  }
  func.func @transform_0(%arg0: i32) -> (i32, i32) {
    %c0_i32 = arith.constant 0 : i32
    %c0_i32_0 = arith.constant 0 : i32
    return %arg0, %c0_i32 : i32, i32
  }
  func.func @transform_1(%arg0: i32) -> (i32, i32) {
    %c0_i32 = arith.constant 0 : i32
    %c0_i32_0 = arith.constant 0 : i32
    %c0_i32_1 = arith.constant 0 : i32
    return %c0_i32, %c0_i32_0 : i32, i32
  }
  func.func @transform_2(%arg0: i32) -> (i32, i32) {
    %c0_i32 = arith.constant 0 : i32
    %c0_i32_0 = arith.constant 0 : i32
    %c0_i32_1 = arith.constant 0 : i32
    return %c0_i32, %c0_i32_0 : i32, i32
  }
  func.func @transform_3(%arg0: i32) -> (i32, i32) {
    %c0_i32 = arith.constant 0 : i32
    %c0_i32_0 = arith.constant 0 : i32
    %c0_i32_1 = arith.constant 0 : i32
    return %c0_i32, %c0_i32_0 : i32, i32
  }
  func.func @transform_4(%arg0: i32) -> (i32, i32) {
    %c0_i32 = arith.constant 0 : i32
    %c0_i32_0 = arith.constant 0 : i32
    %c0_i32_1 = arith.constant 0 : i32
    return %c0_i32, %c0_i32_0 : i32, i32
  }
  func.func @transform_5(%arg0: i32) -> (i32, i32) {
    %c0_i32 = arith.constant 0 : i32
    %c0_i32_0 = arith.constant 0 : i32
    return %arg0, %c0_i32 : i32, i32
  }
}

</mosaic_0001>

<bundles_post_ra>
// kernel: neg.11
= control target key start
LH: loop header
LB: loop body
LE: loop exit
PB: predicated region body
PF: predicated region fallthrough
CT: control target
= control target key end

     0   :  { %s56_s0 = inlined_call_operand.vmem [shape: f32[21,128], index: 0, kind: input, shape index: {}]   ;;  %s57_s1 = inlined_call_operand.vmem [shape: f32[21,128], index: 1, kind: output, shape index: {}]  }
   0x1   :  { %v2_v0 = vld [vmem:[%s56_s0] sm:$0xff]  ;;  %v24_v1 = vld [vmem:[%s56_s0 + $0x8] sm:$0xff]  ;;  %v26_v2 = vld [vmem:[%s56_s0 + $0x10] sm:$0xff] }
   0x2   :  { %v5_v3 = vxor.u32 2147483648, %v2_v0  ;;  %v12_v4 = vxor.u32 2147483648, %v24_v1  ;;  %v20_v5 = vxor.u32 2147483648, %v26_v2 }
   0x4   :  { %7 = vst [vmem:[%s57_s1] sm:$0xff] %v5_v3  ;;  %25 = vst [vmem:[%s57_s1 + $0x8] sm:$0xff] %v12_v4 }
   0x5   :  { %27 = vst [vmem:[%s57_s1 + $0x10] sm:$0xff] %v20_v5 }

// kernel: neg.12
= control target key start
LH: loop header
LB: loop body
LE: loop exit
PB: predicated region body
PF: predicated region fallthrough
CT: control target
= control target key end

     0   :  { %s24_s0 = inlined_call_operand.vmem [shape: f32[21], index: 0, kind: input, shape index: {}]   ;;  %s25_s1 = inlined_call_operand.vmem [shape: f32[21], index: 1, kind: output, shape index: {}]  }
   0x1   :  { %v2_v0 = vld [vmem:[%s24_s0] sm:$0x1] }
   0x2   :  { %v5_v1 = vxor.u32 2147483648, %v2_v0 }
   0x4   :  { %7 = vst [vmem:[%s25_s1] sm:$0x1] %v5_v1 }

// kernel: video_net_moe.1
= control target key start
LH: loop header
LB: loop body
LE: loop exit
PB: predicated region body
PF: predicated region fallthrough
CT: control target
= control target key end

     0   :  { %vm1329_vm1 = vmmov 0   ;;  %s1331_s11 = smov 64   ;;  %s1692_s1 = inlined_call_operand.vmem [shape: bf16[1024,128], index: 1, kind: input, shape index: {}]   ;;  %s1693_s0 = inlined_call_operand.vmem [shape: bf16[8,1024], index: 0, kind: input, shape index: {}]   ;;  %s1694_s4 = inlined_call_operand.vmem [shape: f32[128,128], index: 4, kind: input, shape index: {}]   ;;  %s1695_s2 = inlined_call_operand.vmem [shape: f32[1,128], index: 2, kind: input, shape index: {}]   ;;  %s1696_s3 = inlined_call_operand.vmem [shape: f32[128,128], index: 3, kind: input, shape index: {}]   ;;  %s1697_s5 = inlined_call_operand.vmem [shape: f32[8,128], index: 5, kind: output, shape index: {}]  }
   0x1   :  { %v1250_v0 = vld [vmem:[%s1692_s1 + $0x40] sm:$0xff]   ;;  %v1254_v4 = vld [vmem:[%s1692_s1 + $0x48] sm:$0xff]   ;;  %v1258_v8 = vld [vmem:[%s1692_s1 + $0x50] sm:$0xff]  }
   0x2   :  { %v1251_v1 = vld [vmem:[%s1692_s1 + $0xc0] sm:$0xff]   ;;  %1006 = vmatprep.subr.bf16.mxu0 %v1250_v0  ;;  %v1255_v5 = vld [vmem:[%s1692_s1 + $0xc8] sm:$0xff]   ;;  %v1259_v9 = vld [vmem:[%s1692_s1 + $0xd0] sm:$0xff]  }
   0x3   :  { %v1252_v2 = vld [vmem:[%s1692_s1] sm:$0xff]   ;;  %1028 = vmatprep.subr.bf16.mxu1 %v1251_v1  ;;  %v1256_v6 = vld [vmem:[%s1692_s1 + $0x8] sm:$0xff]   ;;  %v1260_v10 = vld [vmem:[%s1692_s1 + $0x10] sm:$0xff]  }
   0x4   :  { %v1253_v3 = vld [vmem:[%s1692_s1 + $0x80] sm:$0xff]   ;;  %1007 = vmatpush3.bf16.msra.mxu0 %v1252_v2  ;;  %v1257_v7 = vld [vmem:[%s1692_s1 + $0x88] sm:$0xff]   ;;  %v1261_v11 = vld [vmem:[%s1692_s1 + $0x90] sm:$0xff]  }
   0x5   :  { %1029 = vmatpush3.bf16.msra.mxu1 %v1253_v3  ;;  %1008 = vmatprep.subr.bf16.mxu0 %v1254_v4  ;;  %v1262_v12 = vld [vmem:[%s1692_s1 + $0x58] sm:$0xff]   ;;  %v1266_v16 = vld [vmem:[%s1692_s1 + $0x60] sm:$0xff]   ;;  %v1270_v20 = vld [vmem:[%s1692_s1 + $0x68] sm:$0xff]  }
   0x6   :  { %1030 = vmatprep.subr.bf16.mxu1 %v1255_v5  ;;  %v1263_v13 = vld [vmem:[%s1692_s1 + $0xd8] sm:$0xff]   ;;  %v1267_v17 = vld [vmem:[%s1692_s1 + $0xe0] sm:$0xff]   ;;  %v1271_v21 = vld [vmem:[%s1692_s1 + $0xe8] sm:$0xff]  }
   0x7   :  { %v1264_v14 = vld [vmem:[%s1692_s1 + $0x18] sm:$0xff]   ;;  %v1268_v18 = vld [vmem:[%s1692_s1 + $0x20] sm:$0xff]   ;;  %v1272_v22 = vld [vmem:[%s1692_s1 + $0x28] sm:$0xff]  }
   0x8   :  { %1009 = vmatpush3.bf16.msra.mxu0 %v1256_v6  ;;  %v1265_v15 = vld [vmem:[%s1692_s1 + $0x98] sm:$0xff]   ;;  %v1269_v19 = vld [vmem:[%s1692_s1 + $0xa0] sm:$0xff]   ;;  %v1273_v23 = vld [vmem:[%s1692_s1 + $0xa8] sm:$0xff]  }
   0x9   :  { %1031 = vmatpush3.bf16.msra.mxu1 %v1257_v7  ;;  %1010 = vmatprep.subr.bf16.mxu0 %v1258_v8  ;;  %v1274_v24 = vld [vmem:[%s1692_s1 + $0x70] sm:$0xff]   ;;  %v1278_v28 = vld [vmem:[%s1692_s1 + $0x78] sm:$0xff]   ;;  %v23_v32 = vld [vmem:[%s1693_s0] sm:$0xff] }
   0xa   :  { %1032 = vmatprep.subr.bf16.mxu1 %v1259_v9  ;;  %v1275_v25 = vld [vmem:[%s1692_s1 + $0xf0] sm:$0xff]   ;;  %v1279_v29 = vld [vmem:[%s1692_s1 + $0xf8] sm:$0xff]   ;;  %v24_v33 = vld [vmem:[%s1693_s0 + $0x8] sm:$0xff]  ;;  %v934_v34 = vcombine.low %v23_v32, %v23_v32  ;;  %v935_v35 = vcombine.high %v23_v32, %v23_v32 }
   0xb   :  { %v1276_v26 = vld [vmem:[%s1692_s1 + $0x30] sm:$0xff]   ;;  %v1280_v30 = vld [vmem:[%s1692_s1 + $0x38] sm:$0xff]   ;;  %v936_v36 = vcombine.low %v24_v33, %v24_v33  ;;  %v937_v37 = vcombine.high %v24_v33, %v24_v33  ;;  %v1286_v38 = vld [vmem:[%s1692_s1 + $0x140] sm:$0xff]  }
   0xc   :  { %1011 = vmatpush3.bf16.msra.mxu0 %v1260_v10  ;;  %v1277_v27 = vld [vmem:[%s1692_s1 + $0xb0] sm:$0xff]   ;;  %v1281_v31 = vld [vmem:[%s1692_s1 + $0xb8] sm:$0xff]   ;;  %v1287_v39 = vld [vmem:[%s1692_s1 + $0x1c0] sm:$0xff]   ;;  %606 = vmatprep.mubr.bf16.mxu0 %v935_v35 }
   0xd   :  { %1033 = vmatpush3.bf16.msra.mxu1 %v1261_v11  ;;  %1012 = vmatprep.subr.bf16.mxu0 %v1262_v12  ;;  %v1288_v40 = vld [vmem:[%s1692_s1 + $0x100] sm:$0xff]   ;;  %v1290_v42 = vld [vmem:[%s1692_s1 + $0x148] sm:$0xff]   ;;  %v1294_v46 = vld [vmem:[%s1692_s1 + $0x150] sm:$0xff]   ;;  %v1328_v12 = vmov 0.0|0.0  }
   0xe   :  { %1034 = vmatprep.subr.bf16.mxu1 %v1263_v13  ;;  %646 = vmatprep.mubr.bf16.mxu1 %v937_v37  ;;  %v1289_v41 = vld [vmem:[%s1692_s1 + $0x180] sm:$0xff]   ;;  %v1291_v43 = vld [vmem:[%s1692_s1 + $0x1c8] sm:$0xff]   ;;  %v1295_v47 = vld [vmem:[%s1692_s1 + $0x1d0] sm:$0xff]  }
   0xf   :  { %v1292_v44 = vld [vmem:[%s1692_s1 + $0x108] sm:$0xff]   ;;  %v1296_v48 = vld [vmem:[%s1692_s1 + $0x110] sm:$0xff]   ;;  %v1298_v50 = vld [vmem:[%s1692_s1 + $0x158] sm:$0xff]  }
  0x10   :  { %1013 = vmatpush3.bf16.msra.mxu0 %v1264_v14  ;;  %v1293_v45 = vld [vmem:[%s1692_s1 + $0x188] sm:$0xff]   ;;  %v1297_v49 = vld [vmem:[%s1692_s1 + $0x190] sm:$0xff]   ;;  %v1299_v51 = vld [vmem:[%s1692_s1 + $0x1d8] sm:$0xff]  }
  0x11   :  { %1035 = vmatpush3.bf16.msra.mxu1 %v1265_v15  ;;  %1014 = vmatprep.subr.bf16.mxu0 %v1266_v16  ;;  %v1300_v52 = vld [vmem:[%s1692_s1 + $0x118] sm:$0xff]   ;;  %v1302_v54 = vld [vmem:[%s1692_s1 + $0x160] sm:$0xff]   ;;  %v1306_v58 = vld [vmem:[%s1692_s1 + $0x168] sm:$0xff]  }
  0x12   :  { %1036 = vmatprep.subr.bf16.mxu1 %v1267_v17  ;;  %v1301_v53 = vld [vmem:[%s1692_s1 + $0x198] sm:$0xff]   ;;  %v1303_v55 = vld [vmem:[%s1692_s1 + $0x1e0] sm:$0xff]   ;;  %v1307_v59 = vld [vmem:[%s1692_s1 + $0x1e8] sm:$0xff]  }
  0x13   :  { %v1304_v56 = vld [vmem:[%s1692_s1 + $0x120] sm:$0xff]   ;;  %v1308_v60 = vld [vmem:[%s1692_s1 + $0x128] sm:$0xff]   ;;  %v1310_v62 = vld [vmem:[%s1692_s1 + $0x170] sm:$0xff]  }
  0x14   :  { %1015 = vmatpush3.bf16.msra.mxu0 %v1268_v18  ;;  %v1305_v57 = vld [vmem:[%s1692_s1 + $0x1a0] sm:$0xff]   ;;  %v1309_v61 = vld [vmem:[%s1692_s1 + $0x1a8] sm:$0xff]   ;;  %v1311_v63 = vld [vmem:[%s1692_s1 + $0x1f0] sm:$0xff]  }
  0x15   :  { %1037 = vmatpush3.bf16.msra.mxu1 %v1269_v19  ;;  %1016 = vmatprep.subr.bf16.mxu0 %v1270_v20  ;;  %v1312_v0 = vld [vmem:[%s1692_s1 + $0x130] sm:$0xff]   ;;  %v1314_v2 = vld [vmem:[%s1692_s1 + $0x178] sm:$0xff]   ;;  %v836_v13 = vld [vmem:[%s1694_s4] sm:$0xff] }
  0x16   :  { %1038 = vmatprep.subr.bf16.mxu1 %v1271_v21  ;;  %v1313_v1 = vld [vmem:[%s1692_s1 + $0x1b0] sm:$0xff]   ;;  %v1315_v3 = vld [vmem:[%s1692_s1 + $0x1f8] sm:$0xff]   ;;  %v837_v14 = vld [vmem:[%s1694_s4 + $0x8] sm:$0xff] }
  0x17   :  { %v1316_v4 = vld [vmem:[%s1692_s1 + $0x138] sm:$0xff]   ;;  %v25_v6 = vld [vmem:[%s1693_s0 + $0x10] sm:$0xff]  ;;  %v1223_v16 = vpack.c.bf16 %v837_v14, %v836_v13  ;;  %v840_v19 = vld [vmem:[%s1694_s4 + $0x20] sm:$0xff] }
  0x18   :  { %1017 = vmatpush3.bf16.msra.mxu0 %v1272_v22  ;;  %v1317_v5 = vld [vmem:[%s1692_s1 + $0x1b8] sm:$0xff]   ;;  %v938_v7 = vcombine.low %v25_v6, %v25_v6  ;;  %v939_v8 = vcombine.high %v25_v6, %v25_v6  ;;  %v838_v15 = vld [vmem:[%s1694_s4 + $0x10] sm:$0xff]  ;;  %v841_v20 = vld [vmem:[%s1694_s4 + $0x28] sm:$0xff] }
  0x19   :  { %1039 = vmatpush3.bf16.msra.mxu1 %v1273_v23  ;;  %1018 = vmatprep.subr.bf16.mxu0 %v1274_v24  ;;  %v26_v9 = vld [vmem:[%s1693_s0 + $0x18] sm:$0xff]  ;;  %v1229_v21 = vpack.c.bf16 %v841_v20, %v840_v19  ;;  %v842_v22 = vld [vmem:[%s1694_s4 + $0x30] sm:$0xff]  ;;  %v759_v19 = vld [vmem:[%s1696_s3 + $0x48] sm:$0xff] }
  0x1a   :  { %1040 = vmatprep.subr.bf16.mxu1 %v1275_v25  ;;  %v940_v10 = vcombine.low %v26_v9, %v26_v9  ;;  %v941_v11 = vcombine.high %v26_v9, %v26_v9  ;;  %v839_v17 = vld [vmem:[%s1694_s4 + $0x18] sm:$0xff]  ;;  %v755_v9 = vld [vmem:[%s1696_s3 + $0x28] sm:$0xff] }
  0x1b   :  { %v1226_v18 = vpack.c.bf16 %v839_v17, %v838_v15  ;;  %v843_v23 = vld [vmem:[%s1694_s4 + $0x38] sm:$0xff] }
  0x1c   :  { %1019 = vmatpush3.bf16.msra.mxu0 %v1276_v26  ;;  %v1232_v24 = vpack.c.bf16 %v843_v23, %v842_v22  ;;  %v753_v6 = vld [vmem:[%s1696_s3 + $0x18] sm:$0xff]  ;;  %v760_v22 = vld [vmem:[%s1696_s3 + $0x50] sm:$0xff] }
  0x1d   :  { %1041 = vmatpush3.bf16.msra.mxu1 %v1277_v27  ;;  %1020 = vmatprep.subr.bf16.mxu0 %v1278_v28  ;;  %v933_v27 = vld [vmem:[%s1695_s2] ss:$0 sm:$0xff]  ;;  %v757_v13 = vld [vmem:[%s1696_s3 + $0x38] sm:$0xff] }
  0x1e   :  { %1042 = vmatprep.subr.bf16.mxu1 %v1279_v29  ;;  %v761_v23 = vld [vmem:[%s1696_s3 + $0x58] sm:$0xff] }
  0x20   :  { %1021 = vmatpush3.bf16.msra.mxu0 %v1280_v30 }
  0x21   :  { %1043 = vmatpush3.bf16.msra.mxu1 %v1281_v31  ;;  %1050 = vmatprep.subr.bf16.mxu0 %v1286_v38  ;;  %v21_v38 = vlaneseq }
  0x22   :  { %1072 = vmatprep.subr.bf16.mxu1 %v1287_v39 }
  0x23   :  { %607 = vmatmul.mubr.bf16.vlgmr.msra.gmra.mrb[0].mxu0 %v934_v34 }
  0x24   :  { %647 = vmatmul.mubr.bf16.vlgmr.msra.gmra.mrb[0].mxu1 %v936_v36  ;;  %1051 = vmatpush3.bf16.msra.mxu0 %v1288_v40 }
  0x25   :  { %1073 = vmatpush3.bf16.msra.mxu1 %v1289_v41  ;;  %1052 = vmatprep.subr.bf16.mxu0 %v1290_v42 }
  0x26   :  { %1074 = vmatprep.subr.bf16.mxu1 %v1291_v43  ;;  %686 = vmatprep.mubr.bf16.mxu0 %v939_v8  ;;  %v1599_v43 = vand.u32 127, %v21_v38  ;;  %v754_v8 = vld [vmem:[%s1696_s3 + $0x20] sm:$0xff] }
  0x27   :  { %726 = vmatprep.mubr.bf16.mxu1 %v941_v11  ;;  %v756_v11 = vld [vmem:[%s1696_s3 + $0x30] sm:$0xff] }
  0x28   :  { %1053 = vmatpush3.bf16.msra.mxu0 %v1292_v44  ;;  %vm734_vm0 = vcmp.lt.s32.totalorder %v1599_v43, 28  ;;  %v1208_v14 = vpack.c.bf16 %v757_v13, %v756_v11  ;;  %vm922_vm2 = vcmp.lt.s32.totalorder %v1599_v43, 7 }
  0x29   :  { %1075 = vmatpush3.bf16.msra.mxu1 %v1293_v45  ;;  %1054 = vmatprep.subr.bf16.mxu0 %v1294_v46 }
  0x2a   :  { %1076 = vmatprep.subr.bf16.mxu1 %v1295_v47 }
  0x2c   :  { %1055 = vmatpush3.bf16.msra.mxu0 %v1296_v48 }
  0x2d   :  { %1077 = vmatpush3.bf16.msra.mxu1 %v1297_v49  ;;  %1056 = vmatprep.subr.bf16.mxu0 %v1298_v50 }
  0x2e   :  { %1078 = vmatprep.subr.bf16.mxu1 %v1299_v51 }
  0x30   :  { %1057 = vmatpush3.bf16.msra.mxu0 %v1300_v52 }
  0x31   :  { %1079 = vmatpush3.bf16.msra.mxu1 %v1301_v53  ;;  %1058 = vmatprep.subr.bf16.mxu0 %v1302_v54  ;;  %v844_v53 = vld [vmem:[%s1694_s4 + $0x40] sm:$0xff]  ;;  %v845_v54 = vld [vmem:[%s1694_s4 + $0x48] sm:$0xff] }
  0x32   :  { %1080 = vmatprep.subr.bf16.mxu1 %v1303_v55  ;;  %v1235_v55 = vpack.c.bf16 %v845_v54, %v844_v53 }
  0x34   :  { %1059 = vmatpush3.bf16.msra.mxu0 %v1304_v56  ;;  %v846_v56 = vld [vmem:[%s1694_s4 + $0x50] sm:$0xff] }
  0x35   :  { %1081 = vmatpush3.bf16.msra.mxu1 %v1305_v57  ;;  %1060 = vmatprep.subr.bf16.mxu0 %v1306_v58  ;;  %v847_v57 = vld [vmem:[%s1694_s4 + $0x58] sm:$0xff] }
  0x36   :  { %1082 = vmatprep.subr.bf16.mxu1 %v1307_v59  ;;  %v1238_v58 = vpack.c.bf16 %v847_v57, %v846_v56  ;;  %v848_v59 = vld [vmem:[%s1694_s4 + $0x60] sm:$0xff] }
  0x38   :  { %1061 = vmatpush3.bf16.msra.mxu0 %v1308_v60  ;;  %v849_v60 = vld [vmem:[%s1694_s4 + $0x68] sm:$0xff] }
  0x39   :  { %1083 = vmatpush3.bf16.msra.mxu1 %v1309_v61  ;;  %1062 = vmatprep.subr.bf16.mxu0 %v1310_v62  ;;  %v1330_v61 = vmov 0.0   ;;  %v1241_v62 = vpack.c.bf16 %v849_v60, %v848_v59 }
  0x3a   :  { %1084 = vmatprep.subr.bf16.mxu1 %v1311_v63  ;;  %v850_v63 = vld [vmem:[%s1694_s4 + $0x70] sm:$0xff] }
  0x3c   :  { %1063 = vmatpush3.bf16.msra.mxu0 %v1312_v0  ;;  %v851_v0 = vld [vmem:[%s1694_s4 + $0x78] sm:$0xff] }
  0x3d   :  { %1085 = vmatpush3.bf16.msra.mxu1 %v1313_v1  ;;  %1064 = vmatprep.subr.bf16.mxu0 %v1314_v2  ;;  %v1244_v1 = vpack.c.bf16 %v851_v0, %v850_v63  ;;  %v750_v2 = vld [vmem:[%s1696_s3] sm:$0xff] }
  0x3e   :  { %1086 = vmatprep.subr.bf16.mxu1 %v1315_v3  ;;  %v751_v3 = vld [vmem:[%s1696_s3 + $0x8] sm:$0xff] }
  0x40   :  { %1065 = vmatpush3.bf16.msra.mxu0 %v1316_v4  ;;  %v752_v4 = vld [vmem:[%s1696_s3 + $0x10] sm:$0xff] }
  0x41   :  { %1087 = vmatpush3.bf16.msra.mxu1 %v1317_v5  ;;  %1198 = vmatprep.subr.bf16.mxu0 %v1328_v12  ;;  %v1199_v5 = vpack.c.bf16 %v751_v3, %v750_v2 }
  0x42   :  { %1222 = vmatprep.subr.bf16.mxu1 %v1328_v12 }
  0x43   :  { %687 = vmatmul.mubr.bf16.vlgmr.msra.gmra.mrb[4].mxu0 %v938_v7  ;;  %v1202_v7 = vpack.c.bf16 %v753_v6, %v752_v4 }
  0x44   :  { %727 = vmatmul.mubr.bf16.vlgmr.msra.gmra.mrb[4].mxu1 %v940_v10  ;;  %1160 = vmatprep.mubr.msk.f32.mxu0 %vm1329_vm1, %v1330_v61  ;;  %v1205_v10 = vpack.c.bf16 %v755_v9, %v754_v8 }
  0x45   :  { %1224 = vmatpush3.bf16.msra.mxu1 %v1223_v16  ;;  %1195 = vmatprep.mubr.msk.f32.mxu1 %vm1329_vm1, %v1330_v61 }
  0x46   :  { %1225 = vmatprep.subr.bf16.mxu1 %v1328_v12  ;;  %1200 = vmatpush3.bf16.msra.mxu0 %v1199_v5 }
  0x47   :  { %1201 = vmatprep.subr.bf16.mxu0 %v1328_v12 }
  0x49   :  { %1227 = vmatpush3.bf16.msra.mxu1 %v1226_v18  ;;  %v758_v18 = vld [vmem:[%s1696_s3 + $0x40] sm:$0xff] }
  0x4a   :  { %1228 = vmatprep.subr.bf16.mxu1 %v1328_v12  ;;  %1203 = vmatpush3.bf16.msra.mxu0 %v1202_v7 }
  0x4b   :  { %1204 = vmatprep.subr.bf16.mxu0 %v1328_v12 }
  0x4d   :  { %1230 = vmatpush3.bf16.msra.mxu1 %v1229_v21  ;;  %v1211_v21 = vpack.c.bf16 %v759_v19, %v758_v18 }
  0x4e   :  { %1231 = vmatprep.subr.bf16.mxu1 %v1328_v12  ;;  %1206 = vmatpush3.bf16.msra.mxu0 %v1205_v10 }
  0x4f   :  { %1207 = vmatprep.subr.bf16.mxu0 %v1328_v12 }
  0x51   :  { %1233 = vmatpush3.bf16.msra.mxu1 %v1232_v24  ;;  %v1214_v24 = vpack.c.bf16 %v761_v23, %v760_v22 }
  0x52   :  { %1234 = vmatprep.subr.bf16.mxu1 %v1328_v12  ;;  %1209 = vmatpush3.bf16.msra.mxu0 %v1208_v14 }
  0x53   :  { %1210 = vmatprep.subr.bf16.mxu0 %v1328_v12 }
  0x55   :  { %1236 = vmatpush3.bf16.msra.mxu1 %v1235_v55 }
  0x56   :  { %1237 = vmatprep.subr.bf16.mxu1 %v1328_v12  ;;  %1212 = vmatpush3.bf16.msra.mxu0 %v1211_v21 }
  0x57   :  { %1213 = vmatprep.subr.bf16.mxu0 %v1328_v12 }
  0x59   :  { %1239 = vmatpush3.bf16.msra.mxu1 %v1238_v58 }
  0x5a   :  { %1240 = vmatprep.subr.bf16.mxu1 %v1328_v12  ;;  %1215 = vmatpush3.bf16.msra.mxu0 %v1214_v24 }
  0x5b   :  { %1216 = vmatprep.subr.bf16.mxu0 %v1328_v12 }
  0x5d   :  { %1242 = vmatpush3.bf16.msra.mxu1 %v1241_v62 }
  0x5e   :  { %1243 = vmatprep.subr.bf16.mxu1 %v1328_v12 }
  0x61   :  { %1245 = vmatpush3.bf16.msra.mxu1 %v1244_v1 }
  0xf6   :  { %v1022_v25 = vpop.f32.mrb[0].mxu0 }
  0xf7   :  { %v1044_v26 = vpop.f32.mrb[0].mxu1  ;;  %v1023_v28 = vpop.f32.mrb[1].mxu0 }
  0xf8   :  { %v1045_v29 = vpop.f32.mrb[1].mxu1  ;;  %v1024_v30 = vadd.f32 %v1023_v28, %v1022_v25  ;;  %v1025_v32 = vpop.f32.mrb[2].mxu0  ;;  %v762_v25 = vld [vmem:[%s1696_s3 + $0x60] sm:$0xff]  ;;  %v764_v28 = vld [vmem:[%s1696_s3 + $0x70] sm:$0xff] }
  0xf9   :  { %v1046_v31 = vadd.f32 %v1045_v29, %v1044_v26  ;;  %v1047_v33 = vpop.f32.mrb[2].mxu1  ;;  %v1026_v34 = vpop.f32.mrb[3].mxu0  ;;  %v763_v26 = vld [vmem:[%s1696_s3 + $0x68] sm:$0xff]  ;;  %v765_v29 = vld [vmem:[%s1696_s3 + $0x78] sm:$0xff] }
  0xfa   :  { %v1048_v35 = vpop.f32.mrb[3].mxu1  ;;  %v609_v36 = vadd.f32 %v1024_v30, %v933_v27  ;;  %v1217_v27 = vpack.c.bf16 %v763_v26, %v762_v25  ;;  %v1220_v30 = vpack.c.bf16 %v765_v29, %v764_v28 }
  0xfc   :  { %v649_v37 = vadd.f32 %v1046_v31, %v609_v36  ;;  %1218 = vmatpush3.bf16.msra.mxu0 %v1217_v27 }
  0xfd   :  { %1219 = vmatprep.subr.bf16.mxu0 %v1328_v12 }
 0x100   :  { %1221 = vmatpush3.bf16.msra.mxu0 %v1220_v30 }
 0x116   :  { %v1066_v39 = vpop.f32.mrb[4].mxu0 }
 0x117   :  { %v1088_v40 = vpop.f32.mrb[4].mxu1  ;;  %v1067_v41 = vpop.f32.mrb[5].mxu0 }
 0x118   :  { %v1089_v42 = vpop.f32.mrb[5].mxu1  ;;  %v1068_v44 = vadd.f32 %v1067_v41, %v1066_v39  ;;  %v1069_v46 = vpop.f32.mrb[6].mxu0 }
 0x119   :  { %v1090_v45 = vadd.f32 %v1089_v42, %v1088_v40  ;;  %v1091_v47 = vpop.f32.mrb[6].mxu1  ;;  %v1070_v48 = vpop.f32.mrb[7].mxu0 }
 0x11a   :  { %v1092_v49 = vpop.f32.mrb[7].mxu1  ;;  %v689_v50 = vadd.f32 %v1068_v44, %v649_v37 }
 0x11c   :  { %v729_v51 = vadd.f32 %v1090_v45, %v689_v50 }
 0x11e   :  { %v737_v52 = vsel %vm734_vm0, %v729_v51, -inf }
 0x11f   :  { %738 = vmax.xlane.f32.xlu0 %v737_v52 }
 0x1ac   :  { %v739_v15 = vpop.xlane.xlu0 %738 }
 0x1ad   :  { %v740_v16 = vsel %vm734_vm0, %v739_v15, 0.0 }
 0x1ae   :  { %v741_v17 = vsub.f32 %v729_v51, %v740_v16 }
 0x1b0   :  { %v742_v20 = vmul.f32 1.442695, %v741_v17 }
 0x1b2   :  { %1322 = vpow2.f32 %v742_v20 }
 0x1bc   :  { %v1323_v31 = vpop.eup %1322 }
 0x1bd   :  { %v744_v32 = vmin.f32 %v1323_v31, 3e+38 }
 0x1bf   :  { %745 = vrot.lane.b32.xlu0 %v744_v32, %s1331_s11  ;;  %1196 = vmatmul.mubr.f32.vlgmr.msra.gmra.mrb[8].mxu1 %v744_v32 }
 0x231   :  { %v746_v33 = vpop.permute.xlu0 %745 }
 0x232   :  { %v747_v34 = vadd.f32 1.0, %v746_v33 }
 0x234   :  { %1324 = vrcp.f32 %v747_v34 }
 0x23e   :  { %v1325_v35 = vpop.eup %1324 }
 0x23f   :  { %v749_v36 = vmul.f32 %v1325_v35, %v744_v32 }
 0x241   :  { %1161 = vmatmul.mubr.f32.vlgmr.msra.gmra.mrb[8].mxu0 %v749_v36 }
 0x292   :  { %v918_v37 = vpop.f32.mrb[8].mxu1 }
 0x293   :  { %v1197_v38 = vpop.f32.mrb[9].mxu1  ;;  %1326 = vrcp.f32 %v918_v37 }
 0x29d   :  { %v1327_v39 = vpop.eup %1326 }
 0x314   :  { %v832_v40 = vpop.f32.mrb[8].mxu0 }
 0x315   :  { %v924_v12 = vmul.f32 %v1327_v39, %v832_v40  ;;  %v1162_v41 = vpop.f32.mrb[9].mxu0 }
 0x317   :  { %v927_v42 = vsel %vm922_vm2, %v924_v12, 0.0 }
 0x318   :  { %928 = vst [vmem:[%s1697_s5] sm:$0xff] %v927_v42 }

</bundles_post_ra>
